<compile_context>
chip_gen: v7x
topology: tpu7x:2x2x1
jax: 0.10.0
libtpu: 0.0.40
codegen_flags: <defaults>
</compile_context>

<pallas_src>
import functools
import math

import jax
import jax.numpy as jnp
from jax import lax
from jax.experimental import pallas as pl
from jax.experimental.pallas import tpu as pltpu


# ------------------------------ fused kernel -------------------------------

def _tcanet_fused_kernel(*refs, num_levels, num_sub_blocks, dilations,
                         key_size, ksize, attn_levels):
    # ---- unpack refs (static structure) ----
    it = iter(refs)
    x_ref = next(it)
    level_refs = []
    for _ in range(num_levels):
        wqkv_ref = next(it)
        bqkv_ref = next(it)
        convs = [(next(it), next(it)) for _ in range(num_sub_blocks)]
        level_refs.append((wqkv_ref, bqkv_ref, convs))
    dec_w_ref = next(it)
    dec_b_ref = next(it)
    logits_ref = next(it)
    attn_ref = next(it)

    x3 = x_ref[...].astype(jnp.float32)               # (NB, T, C) channels-last
    NB, T, _ = x3.shape
    K = key_size
    inv_sqrt_k = jnp.float32(1.0 / math.sqrt(key_size))

    # 2-D causal mask shared across levels, broadcast over the batch block.
    qi = lax.broadcasted_iota(jnp.int32, (T, T), 0)   # query / time index
    ki = lax.broadcasted_iota(jnp.int32, (T, T), 1)   # key index
    future = ki > qi

    for lvl in range(num_levels):
        wqkv_ref, bqkv_ref, convs = level_refs[lvl]
        d = dilations[lvl]
        C = x3.shape[-1]
        x2 = x3.reshape(NB * T, C)

        # ---- attention: fused Q/K/V projection (bf16 MXU, f32 accumulate) --
        qkv = jnp.dot(x2.astype(jnp.bfloat16), wqkv_ref[...],
                      preferred_element_type=jnp.float32) + bqkv_ref[...]
        qkv = qkv.reshape(NB, T, 2 * K + C)
        q = qkv[:, :, :K].astype(jnp.bfloat16)
        k = qkv[:, :, K:2 * K].astype(jnp.bfloat16)
        v = qkv[:, :, 2 * K:].astype(jnp.bfloat16)

        scores = jnp.einsum('nqd,nkd->nqk', q, k,
                            preferred_element_type=jnp.float32)
        # Causal mask applied BEFORE the 1/sqrt(key_size) scaling (as in ref).
        scores = jnp.where(future, jnp.float32(-1e30), scores)
        scores = scores * inv_sqrt_k
        # Reference quirk: F.softmax(dim=1) on (N, Tq, Tk) -> normalize over
        # the QUERY axis (axis=1).  Keep this math in f32.
        m = jnp.max(scores, axis=1, keepdims=True)
        e = jnp.exp(scores - m)
        denom = jnp.sum(e, axis=1, keepdims=True)
        w = e * pl.reciprocal(denom, approx=True)          # (NB, T, T) f32

        # Only write back the attention maps the wrapper returns.
        for slot, want_lvl in enumerate(attn_levels):
            if want_lvl == lvl:
                attn_ref[:, slot, :] = (
                    w.reshape(NB, T * T).astype(attn_ref.dtype))

        h3 = jnp.einsum('nqk,nkc->nqc', w.astype(jnp.bfloat16), v,
                        preferred_element_type=jnp.float32)

        # ---- dilated causal conv + ReLU: per-tap shift + accumulate --------
        for wc_ref, bc_ref in convs:
            c_in = h3.shape[-1]
            c_out = wc_ref.shape[-1]
            acc = jnp.zeros((NB * T, c_out), jnp.float32)
            for tap in range(ksize):
                shift = (ksize - 1 - tap) * d
                if shift == 0:
                    shifted = h3
                elif shift >= T:
                    shifted = jnp.zeros_like(h3)
                else:
                    # Causal delay by `shift` steps with implicit zero padding
                    # (== left pad + Chomp1d in torch).  Static pad + slice.
                    shifted = jnp.concatenate(
                        [jnp.zeros((NB, shift, c_in), jnp.float32),
                         h3[:, :T - shift, :]], axis=1)
                acc = acc + jnp.dot(
                    shifted.reshape(NB * T, c_in).astype(jnp.bfloat16),
                    wc_ref[tap],                    # (Cin, Cout) bf16
                    preferred_element_type=jnp.float32)
            h2 = jnp.maximum(acc + bc_ref[...], 0.0)        # conv + ReLU
            h3 = h2.reshape(NB, T, c_out)

        # ---- residual add + ReLU (downsample is None: channels match) ----
        x3 = jnp.maximum(h3 + x3, 0.0)

    # ---- decoder Linear over all NB*T rows (vocab padded to 128 lanes) ----
    x2 = x3.reshape(NB * T, x3.shape[-1]).astype(jnp.bfloat16)
    logits = jnp.dot(x2, dec_w_ref[...],
                     preferred_element_type=jnp.float32) + dec_b_ref[...]
    logits_ref[...] = logits.reshape(NB, T, -1).astype(logits_ref.dtype)


def _const_spec(shape):
    nd = len(shape)
    return pl.BlockSpec(tuple(shape), lambda b, _nd=nd: (0,) * _nd)


# --------------------------- parameters & glue -----------------------------

def fold_weight_norm(v, g):
    # weight_norm: w = g * v / ||v||, norm taken over (in_ch, tap) per out_ch.
    norm = jnp.sqrt(jnp.sum(v * v, axis=(1, 2), keepdims=True))
    return g * v / norm


def init_params(key, vocab, emb_size, num_channels, key_size, ksize,
                num_sub_blocks):
    n_keys = 4 + len(num_channels) * (6 + 3 * num_sub_blocks)
    keys = iter(jax.random.split(key, n_keys))
    params = {}
    params["emb"] = 0.01 * jax.random.normal(next(keys), (vocab, emb_size),
                                             jnp.float32)
    levels = []
    c_in = emb_size
    for lvl, c_out in enumerate(num_channels):
        p = {}
        wq = 0.1 * jax.random.normal(next(keys), (c_in, key_size), jnp.float32)
        bq = 0.1 * jax.random.normal(next(keys), (key_size,), jnp.float32)
        wk = 0.1 * jax.random.normal(next(keys), (c_in, key_size), jnp.float32)
        bk = 0.1 * jax.random.normal(next(keys), (key_size,), jnp.float32)
        wv = 0.1 * jax.random.normal(next(keys), (c_in, c_in), jnp.float32)
        bv = 0.1 * jax.random.normal(next(keys), (c_in,), jnp.float32)
        # Fused QKV projection weight: q | k | v along the output dim.
        p["wqkv"] = jnp.concatenate([wq, wk, wv], axis=1)       # (Cin, 2K+Cin)
        p["bqkv"] = jnp.concatenate([bq, bk, bv])[None, :]      # (1, 2K+Cin)
        convs = []
        sub_in = c_in
        for _ in range(num_sub_blocks):
            v = 0.01 * jax.random.normal(next(keys), (c_out, sub_in, ksize),
                                         jnp.float32)
            g = 1.0 + 0.1 * jax.random.normal(next(keys), (c_out, 1, 1),
                                              jnp.float32)
            w = fold_weight_norm(v, g)                   # (Cout, Cin, k)
            w_taps = jnp.transpose(w, (2, 1, 0))         # (k, Cin, Cout)
            bias = 0.01 * jax.random.normal(next(keys), (c_out,), jnp.float32)
            convs.append((w_taps, bias[None, :]))
            sub_in = c_out
        p["convs"] = convs
        levels.append(p)
        c_in = c_out
    params["dec_w"] = 0.01 * jax.random.normal(
        next(keys), (num_channels[-1], vocab), jnp.float32)
    params["dec_b"] = jnp.zeros((1, vocab), jnp.float32)
    params["levels"] = levels
    return params


def tcanet_forward(tokens, params, *, key_size, ksize, num_sub_blocks):
    # Embedding lookup is a row gather; emb_dropout is an eval-mode identity.
    # TODO(synk): embedding gather / dropout are not implemented as Pallas kernels.
    x = jnp.take(params["emb"], tokens, axis=0).astype(jnp.float32)  # (N,T,E)
    N, T, _ = x.shape
    levels = params["levels"]
    num_levels = len(levels)
    dilations = tuple(2 ** l for l in range(num_levels))
    attn_levels = (0, num_levels // 2, num_levels - 1)

    vocab = params["dec_w"].shape[1]
    vp = ((vocab + 127) // 128) * 128                     # lane-dense logits
    dec_w = jnp.pad(params["dec_w"],
                    ((0, 0), (0, vp - vocab))).astype(jnp.bfloat16)
    dec_b = jnp.pad(params["dec_b"], ((0, 0), (0, vp - vocab)))

    # Batch-block grid: >=2 "parallel" blocks -> both TensorCores on v7x and
    # re-enabled BlockSpec double-buffering (harmless on v5e/v6e).
    gb = 2 if (N >= 2 and N % 2 == 0) else 1
    nb = N // gb

    flat_inputs = [x]
    in_specs = [pl.BlockSpec((nb, T, x.shape[-1]), lambda b: (b, 0, 0))]
    for p in levels:
        wqkv = p["wqkv"].astype(jnp.bfloat16)
        flat_inputs += [wqkv, p["bqkv"]]
        in_specs += [_const_spec(wqkv.shape), _const_spec(p["bqkv"].shape)]
        for (w_taps, b) in p["convs"]:
            w16 = w_taps.astype(jnp.bfloat16)
            flat_inputs += [w16, b]
            in_specs += [_const_spec(w16.shape), _const_spec(b.shape)]
    flat_inputs += [dec_w, dec_b]
    in_specs += [_const_spec(dec_w.shape), _const_spec(dec_b.shape)]

    out_shapes = (
        jax.ShapeDtypeStruct((N, T, vp), jnp.float32),        # logits (padded)
        jax.ShapeDtypeStruct((N, 3, T * T), jnp.bfloat16),    # 3 attn maps
    )
    out_specs = (
        pl.BlockSpec((nb, T, vp), lambda b: (b, 0, 0)),
        pl.BlockSpec((nb, 3, T * T), lambda b: (b, 0, 0)),
    )

    # Explicit VMEM budget sized to the resident footprint (weights +
    # activations + outputs), with slack; clipped below v7x's 64 MiB physical.
    in_bytes = sum(int(a.size) * a.dtype.itemsize for a in flat_inputs)
    out_bytes = N * T * vp * 4 + N * 3 * T * T * 2
    vmem_limit = int(min(max(4 * (in_bytes + out_bytes) + (8 << 20),
                             32 << 20), 56 << 20))

    kern = functools.partial(
        _tcanet_fused_kernel,
        num_levels=num_levels, num_sub_blocks=num_sub_blocks,
        dilations=dilations, key_size=key_size, ksize=ksize,
        attn_levels=attn_levels)

    logits_p, attn_p = pl.pallas_call(
        kern,
        out_shape=out_shapes,
        grid=(gb,),
        in_specs=in_specs,
        out_specs=out_specs,
        compiler_params=pltpu.CompilerParams(
            dimension_semantics=("parallel",),
            vmem_limit_bytes=vmem_limit),
    )(*flat_inputs)

    logits = logits_p[:, :, :vocab]                       # (N, L, vocab)
    attn_list = [attn_p[:, s, :].reshape(N, T, T).astype(jnp.float32)
                 for s in range(3)]
    return logits, attn_list


if __name__ == "__main__":
    N, T = 2, 16                 # batch, seq_len
    VOCAB, EMB = 64, 32          # input_output_size, emb_size
    NUM_CHANNELS = [32, 32]      # two temporal levels
    KEY_SIZE = 16
    KSIZE = 2
    NUM_SUB_BLOCKS = 1

    root = jax.random.PRNGKey(0)
    pkey, dkey = jax.random.split(root)
    params = init_params(pkey, VOCAB, EMB, NUM_CHANNELS, KEY_SIZE, KSIZE,
                         NUM_SUB_BLOCKS)
    tokens = jax.random.randint(dkey, (N, T), 0, VOCAB, dtype=jnp.int32)

    fwd = jax.jit(functools.partial(tcanet_forward, key_size=KEY_SIZE,
                                    ksize=KSIZE,
                                    num_sub_blocks=NUM_SUB_BLOCKS))
    logits, attns = fwd(tokens, params)
    jax.block_until_ready(logits)
    for a in attns:
        jax.block_until_ready(a)

    assert logits.shape == (N, T, VOCAB)
    assert all(a.shape == (N, T, T) for a in attns)
    assert bool(jnp.all(jnp.isfinite(logits)))
    assert all(bool(jnp.all(jnp.isfinite(a))) for a in attns)
    print("KERNEL_OK")
</pallas_src>

<mosaic_0001>
module attributes {stable_mosaic.version = 11 : i64} {
  func.func @_tcanet_fused_kernel(%arg0: i32, %arg1: memref<1x16x32xf32, #tpu.memory_space<vmem>>, %arg2: memref<32x64xbf16, #tpu.memory_space<vmem>>, %arg3: memref<1x64xf32, #tpu.memory_space<vmem>>, %arg4: memref<2x32x32xbf16, #tpu.memory_space<vmem>>, %arg5: memref<1x32xf32, #tpu.memory_space<vmem>>, %arg6: memref<32x64xbf16, #tpu.memory_space<vmem>>, %arg7: memref<1x64xf32, #tpu.memory_space<vmem>>, %arg8: memref<2x32x32xbf16, #tpu.memory_space<vmem>>, %arg9: memref<1x32xf32, #tpu.memory_space<vmem>>, %arg10: memref<32x128xbf16, #tpu.memory_space<vmem>>, %arg11: memref<1x128xf32, #tpu.memory_space<vmem>>, %arg12: memref<1x16x128xf32, #tpu.memory_space<vmem>>, %arg13: memref<1x3x256xbf16, #tpu.memory_space<vmem>>) attributes {dimension_semantics = [#tpu.dimension_semantics<parallel>], iteration_bounds = array<i64: 2>, scalar_prefetch = 0 : i64, scratch_operands = 0 : i64, tpu.core_type = #tpu.core_type<tc>, window_params = [{transform_indices = @transform_0, window_bounds = array<i64: 1, 16, 32>}, {pipeline_mode = #tpu.pipeline_mode<synchronous>, transform_indices = @transform_1, window_bounds = array<i64: 32, 64>}, {pipeline_mode = #tpu.pipeline_mode<synchronous>, transform_indices = @transform_2, window_bounds = array<i64: 1, 64>}, {pipeline_mode = #tpu.pipeline_mode<synchronous>, transform_indices = @transform_3, window_bounds = array<i64: 2, 32, 32>}, {pipeline_mode = #tpu.pipeline_mode<synchronous>, transform_indices = @transform_4, window_bounds = array<i64: 1, 32>}, {pipeline_mode = #tpu.pipeline_mode<synchronous>, transform_indices = @transform_5, window_bounds = array<i64: 32, 64>}, {pipeline_mode = #tpu.pipeline_mode<synchronous>, transform_indices = @transform_6, window_bounds = array<i64: 1, 64>}, {pipeline_mode = #tpu.pipeline_mode<synchronous>, transform_indices = @transform_7, window_bounds = array<i64: 2, 32, 32>}, {pipeline_mode = #tpu.pipeline_mode<synchronous>, transform_indices = @transform_8, window_bounds = array<i64: 1, 32>}, {pipeline_mode = #tpu.pipeline_mode<synchronous>, transform_indices = @transform_9, window_bounds = array<i64: 32, 128>}, {pipeline_mode = #tpu.pipeline_mode<synchronous>, transform_indices = @transform_10, window_bounds = array<i64: 1, 128>}, {transform_indices = @transform_11, window_bounds = array<i64: 1, 16, 128>}, {transform_indices = @transform_12, window_bounds = array<i64: 1, 3, 256>}]} {
    %c0 = arith.constant 0 : index
    %c0_0 = arith.constant 0 : index
    %c0_1 = arith.constant 0 : index
    %0 = vector.load %arg1[%c0, %c0_0, %c0_1] : memref<1x16x32xf32, #tpu.memory_space<vmem>>, vector<1x16x32xf32>
    %1 = tpu.iota {dimensions = array<i32: 0>} : vector<16x16xi32>
    %2 = tpu.iota {dimensions = array<i32: 1>} : vector<16x16xi32>
    %3 = arith.cmpi sgt, %2, %1 : vector<16x16xi32>
    %4 = vector.shape_cast %0 : vector<1x16x32xf32> to vector<16x32xf32>
    %5 = arith.truncf %4 : vector<16x32xf32> to vector<16x32xbf16>
    %c0_2 = arith.constant 0 : index
    %c0_3 = arith.constant 0 : index
    %6 = vector.load %arg2[%c0_2, %c0_3] : memref<32x64xbf16, #tpu.memory_space<vmem>>, vector<32x64xbf16>
    %cst = arith.constant dense<0.000000e+00> : vector<16x64xf32>
    %7 = tpu.matmul %5, %6, %cst {dimension_numbers = #tpu.dot_dimension_numbers<[1], [0], [0], [1], [0, 0, 1, 1], [], []>} : vector<16x32xbf16>, vector<32x64xbf16>, vector<16x64xf32> -> vector<16x64xf32>
    %c0_4 = arith.constant 0 : index
    %c0_5 = arith.constant 0 : index
    %8 = vector.load %arg3[%c0_4, %c0_5] : memref<1x64xf32, #tpu.memory_space<vmem>>, vector<1x64xf32>
    %9 = vector.broadcast %8 : vector<1x64xf32> to vector<16x64xf32>
    %10 = arith.addf %7, %9 : vector<16x64xf32>
    %11 = vector.shape_cast %10 : vector<16x64xf32> to vector<1x16x64xf32>
    %12 = vector.extract_strided_slice %11 {offsets = [0, 0, 0], sizes = [1, 16, 16], strides = [1, 1, 1]} : vector<1x16x64xf32> to vector<1x16x16xf32>
    %13 = arith.truncf %12 : vector<1x16x16xf32> to vector<1x16x16xbf16>
    %14 = vector.extract_strided_slice %11 {offsets = [0, 0, 16], sizes = [1, 16, 16], strides = [1, 1, 1]} : vector<1x16x64xf32> to vector<1x16x16xf32>
    %15 = arith.truncf %14 : vector<1x16x16xf32> to vector<1x16x16xbf16>
    %16 = vector.extract_strided_slice %11 {offsets = [0, 0, 32], sizes = [1, 16, 32], strides = [1, 1, 1]} : vector<1x16x64xf32> to vector<1x16x32xf32>
    %17 = arith.truncf %16 : vector<1x16x32xf32> to vector<1x16x32xbf16>
    "tpu.trace_start"() <{level = 10 : i32, message = "nqd,nkd->nqk"}> : () -> ()
    %cst_6 = arith.constant dense<0.000000e+00> : vector<1x16x16xf32>
    %18 = tpu.matmul %13, %15, %cst_6 {dimension_numbers = #tpu.dot_dimension_numbers<[2], [2], [1], [1], [0, 0, 0, 1, 1, 1], [0], [0]>} : vector<1x16x16xbf16>, vector<1x16x16xbf16>, vector<1x16x16xf32> -> vector<1x16x16xf32>
    %cst_7 = arith.constant -1.000000e+30 : f32
    "tpu.trace_stop"() : () -> ()
    %19 = vector.shape_cast %3 : vector<16x16xi1> to vector<1x16x16xi1>
    %20 = vector.broadcast %cst_7 : f32 to vector<1x16x16xf32>
    %21 = arith.select %19, %20, %18 : vector<1x16x16xi1>, vector<1x16x16xf32>
    %cst_8 = arith.constant 2.500000e-01 : f32
    %22 = vector.broadcast %cst_8 : f32 to vector<1x16x16xf32>
    %23 = arith.mulf %21, %22 : vector<1x16x16xf32>
    %cst_9 = arith.constant dense<0xFF800000> : vector<1x16xf32>
    %24 = vector.multi_reduction <maximumf>, %23, %cst_9 [1] : vector<1x16x16xf32> to vector<1x16xf32>
    %25 = vector.shape_cast %24 : vector<1x16xf32> to vector<1x1x16xf32>
    %26 = vector.broadcast %25 : vector<1x1x16xf32> to vector<1x16x16xf32>
    %27 = arith.subf %23, %26 : vector<1x16x16xf32>
    %28 = math.exp %27 : vector<1x16x16xf32>
    %cst_10 = arith.constant dense<0.000000e+00> : vector<1x16xf32>
    %29 = vector.multi_reduction <add>, %28, %cst_10 [1] : vector<1x16x16xf32> to vector<1x16xf32>
    %30 = vector.shape_cast %29 : vector<1x16xf32> to vector<1x1x16xf32>
    %31 = tpu.reciprocal %30 {approx = true} : vector<1x1x16xf32> -> vector<1x1x16xf32>
    %32 = vector.broadcast %31 : vector<1x1x16xf32> to vector<1x16x16xf32>
    %33 = arith.mulf %28, %32 : vector<1x16x16xf32>
    %34 = vector.shape_cast %33 : vector<1x16x16xf32> to vector<1x256xf32>
    %35 = arith.truncf %34 : vector<1x256xf32> to vector<1x256xbf16>
    %c0_11 = arith.constant 0 : index
    %c0_12 = arith.constant 0 : index
    %c0_13 = arith.constant 0 : index
    %36 = vector.load %arg13[%c0_11, %c0_12, %c0_13] : memref<1x3x256xbf16, #tpu.memory_space<vmem>>, vector<1x1x256xbf16>
    %37 = vector.shape_cast %36 : vector<1x1x256xbf16> to vector<1x256xbf16>
    %38 = vector.shape_cast %35 : vector<1x256xbf16> to vector<1x1x256xbf16>
    tpu.vector_store %arg13[%c0_11, %c0_12, %c0_13], %38 {strides = array<i32>} : memref<1x3x256xbf16, #tpu.memory_space<vmem>>, vector<1x1x256xbf16>,
    %39 = arith.truncf %33 : vector<1x16x16xf32> to vector<1x16x16xbf16>
    "tpu.trace_start"() <{level = 10 : i32, message = "nqk,nkc->nqc"}> : () -> ()
    %cst_14 = arith.constant dense<0.000000e+00> : vector<1x16x32xf32>
    %40 = tpu.matmul %39, %17, %cst_14 {dimension_numbers = #tpu.dot_dimension_numbers<[2], [1], [1], [2], [0, 0, 0, 1, 1, 2], [0], [0]>} : vector<1x16x16xbf16>, vector<1x16x32xbf16>, vector<1x16x32xf32> -> vector<1x16x32xf32>
    %cst_15 = arith.constant 0.000000e+00 : f32
    "tpu.trace_stop"() : () -> ()
    %41 = vector.broadcast %cst_15 : f32 to vector<16x32xf32>
    %cst_16 = arith.constant 0.000000e+00 : f32
    %42 = vector.broadcast %cst_16 : f32 to vector<1x1x32xf32>
    %43 = vector.extract_strided_slice %40 {offsets = [0, 0, 0], sizes = [1, 15, 32], strides = [1, 1, 1]} : vector<1x16x32xf32> to vector<1x15x32xf32>
    %44 = tpu.concatenate %42, %43 in 1 : vector<1x1x32xf32>, vector<1x15x32xf32> -> vector<1x16x32xf32>
    %45 = vector.shape_cast %44 : vector<1x16x32xf32> to vector<16x32xf32>
    %46 = arith.truncf %45 : vector<16x32xf32> to vector<16x32xbf16>
    %c0_17 = arith.constant 0 : index
    %c0_18 = arith.constant 0 : index
    %c0_19 = arith.constant 0 : index
    %47 = vector.load %arg4[%c0_17, %c0_18, %c0_19] : memref<2x32x32xbf16, #tpu.memory_space<vmem>>, vector<1x32x32xbf16>
    %48 = vector.shape_cast %47 : vector<1x32x32xbf16> to vector<32x32xbf16>
    %cst_20 = arith.constant dense<0.000000e+00> : vector<16x32xf32>
    %49 = tpu.matmul %46, %48, %cst_20 {dimension_numbers = #tpu.dot_dimension_numbers<[1], [0], [0], [1], [0, 0, 1, 1], [], []>} : vector<16x32xbf16>, vector<32x32xbf16>, vector<16x32xf32> -> vector<16x32xf32>
    %50 = arith.addf %41, %49 : vector<16x32xf32>
    %51 = vector.shape_cast %40 : vector<1x16x32xf32> to vector<16x32xf32>
    %52 = arith.truncf %51 : vector<16x32xf32> to vector<16x32xbf16>
    %c1 = arith.constant 1 : index
    %c0_21 = arith.constant 0 : index
    %c0_22 = arith.constant 0 : index
    %53 = vector.load %arg4[%c1, %c0_21, %c0_22] : memref<2x32x32xbf16, #tpu.memory_space<vmem>>, vector<1x32x32xbf16>
    %54 = vector.shape_cast %53 : vector<1x32x32xbf16> to vector<32x32xbf16>
    %cst_23 = arith.constant dense<0.000000e+00> : vector<16x32xf32>
    %55 = tpu.matmul %52, %54, %cst_23 {dimension_numbers = #tpu.dot_dimension_numbers<[1], [0], [0], [1], [0, 0, 1, 1], [], []>} : vector<16x32xbf16>, vector<32x32xbf16>, vector<16x32xf32> -> vector<16x32xf32>
    %56 = arith.addf %50, %55 : vector<16x32xf32>
    %c0_24 = arith.constant 0 : index
    %c0_25 = arith.constant 0 : index
    %57 = vector.load %arg5[%c0_24, %c0_25] : memref<1x32xf32, #tpu.memory_space<vmem>>, vector<1x32xf32>
    %58 = vector.broadcast %57 : vector<1x32xf32> to vector<16x32xf32>
    %59 = arith.addf %56, %58 : vector<16x32xf32>
    %cst_26 = arith.constant 0.000000e+00 : f32
    %60 = vector.broadcast %cst_26 : f32 to vector<16x32xf32>
    %61 = arith.maximumf %59, %60 : vector<16x32xf32>
    %62 = vector.shape_cast %61 : vector<16x32xf32> to vector<1x16x32xf32>
    %63 = arith.addf %62, %0 : vector<1x16x32xf32>
    %cst_27 = arith.constant 0.000000e+00 : f32
    %64 = vector.broadcast %cst_27 : f32 to vector<1x16x32xf32>
    %65 = arith.maximumf %63, %64 : vector<1x16x32xf32>
    %66 = vector.shape_cast %65 : vector<1x16x32xf32> to vector<16x32xf32>
    %67 = arith.truncf %66 : vector<16x32xf32> to vector<16x32xbf16>
    %c0_28 = arith.constant 0 : index
    %c0_29 = arith.constant 0 : index
    %68 = vector.load %arg6[%c0_28, %c0_29] : memref<32x64xbf16, #tpu.memory_space<vmem>>, vector<32x64xbf16>
    %cst_30 = arith.constant dense<0.000000e+00> : vector<16x64xf32>
    %69 = tpu.matmul %67, %68, %cst_30 {dimension_numbers = #tpu.dot_dimension_numbers<[1], [0], [0], [1], [0, 0, 1, 1], [], []>} : vector<16x32xbf16>, vector<32x64xbf16>, vector<16x64xf32> -> vector<16x64xf32>
    %c0_31 = arith.constant 0 : index
    %c0_32 = arith.constant 0 : index
    %70 = vector.load %arg7[%c0_31, %c0_32] : memref<1x64xf32, #tpu.memory_space<vmem>>, vector<1x64xf32>
    %71 = vector.broadcast %70 : vector<1x64xf32> to vector<16x64xf32>
    %72 = arith.addf %69, %71 : vector<16x64xf32>
    %73 = vector.shape_cast %72 : vector<16x64xf32> to vector<1x16x64xf32>
    %74 = vector.extract_strided_slice %73 {offsets = [0, 0, 0], sizes = [1, 16, 16], strides = [1, 1, 1]} : vector<1x16x64xf32> to vector<1x16x16xf32>
    %75 = arith.truncf %74 : vector<1x16x16xf32> to vector<1x16x16xbf16>
    %76 = vector.extract_strided_slice %73 {offsets = [0, 0, 16], sizes = [1, 16, 16], strides = [1, 1, 1]} : vector<1x16x64xf32> to vector<1x16x16xf32>
    %77 = arith.truncf %76 : vector<1x16x16xf32> to vector<1x16x16xbf16>
    %78 = vector.extract_strided_slice %73 {offsets = [0, 0, 32], sizes = [1, 16, 32], strides = [1, 1, 1]} : vector<1x16x64xf32> to vector<1x16x32xf32>
    %79 = arith.truncf %78 : vector<1x16x32xf32> to vector<1x16x32xbf16>
    "tpu.trace_start"() <{level = 10 : i32, message = "nqd,nkd->nqk"}> : () -> ()
    %cst_33 = arith.constant dense<0.000000e+00> : vector<1x16x16xf32>
    %80 = tpu.matmul %75, %77, %cst_33 {dimension_numbers = #tpu.dot_dimension_numbers<[2], [2], [1], [1], [0, 0, 0, 1, 1, 1], [0], [0]>} : vector<1x16x16xbf16>, vector<1x16x16xbf16>, vector<1x16x16xf32> -> vector<1x16x16xf32>
    %cst_34 = arith.constant -1.000000e+30 : f32
    "tpu.trace_stop"() : () -> ()
    %81 = vector.shape_cast %3 : vector<16x16xi1> to vector<1x16x16xi1>
    %82 = vector.broadcast %cst_34 : f32 to vector<1x16x16xf32>
    %83 = arith.select %81, %82, %80 : vector<1x16x16xi1>, vector<1x16x16xf32>
    %cst_35 = arith.constant 2.500000e-01 : f32
    %84 = vector.broadcast %cst_35 : f32 to vector<1x16x16xf32>
    %85 = arith.mulf %83, %84 : vector<1x16x16xf32>
    %cst_36 = arith.constant dense<0xFF800000> : vector<1x16xf32>
    %86 = vector.multi_reduction <maximumf>, %85, %cst_36 [1] : vector<1x16x16xf32> to vector<1x16xf32>
    %87 = vector.shape_cast %86 : vector<1x16xf32> to vector<1x1x16xf32>
    %88 = vector.broadcast %87 : vector<1x1x16xf32> to vector<1x16x16xf32>
    %89 = arith.subf %85, %88 : vector<1x16x16xf32>
    %90 = math.exp %89 : vector<1x16x16xf32>
    %cst_37 = arith.constant dense<0.000000e+00> : vector<1x16xf32>
    %91 = vector.multi_reduction <add>, %90, %cst_37 [1] : vector<1x16x16xf32> to vector<1x16xf32>
    %92 = vector.shape_cast %91 : vector<1x16xf32> to vector<1x1x16xf32>
    %93 = tpu.reciprocal %92 {approx = true} : vector<1x1x16xf32> -> vector<1x1x16xf32>
    %94 = vector.broadcast %93 : vector<1x1x16xf32> to vector<1x16x16xf32>
    %95 = arith.mulf %90, %94 : vector<1x16x16xf32>
    %96 = vector.shape_cast %95 : vector<1x16x16xf32> to vector<1x256xf32>
    %97 = arith.truncf %96 : vector<1x256xf32> to vector<1x256xbf16>
    %c0_38 = arith.constant 0 : index
    %c1_39 = arith.constant 1 : index
    %c0_40 = arith.constant 0 : index
    %98 = vector.load %arg13[%c0_38, %c1_39, %c0_40] : memref<1x3x256xbf16, #tpu.memory_space<vmem>>, vector<1x1x256xbf16>
    %99 = vector.shape_cast %98 : vector<1x1x256xbf16> to vector<1x256xbf16>
    %100 = vector.shape_cast %97 : vector<1x256xbf16> to vector<1x1x256xbf16>
    tpu.vector_store %arg13[%c0_38, %c1_39, %c0_40], %100 {strides = array<i32>} : memref<1x3x256xbf16, #tpu.memory_space<vmem>>, vector<1x1x256xbf16>,
    %101 = vector.shape_cast %95 : vector<1x16x16xf32> to vector<1x256xf32>
    %102 = arith.truncf %101 : vector<1x256xf32> to vector<1x256xbf16>
    %c0_41 = arith.constant 0 : index
    %c2 = arith.constant 2 : index
    %c0_42 = arith.constant 0 : index
    %103 = vector.load %arg13[%c0_41, %c2, %c0_42] : memref<1x3x256xbf16, #tpu.memory_space<vmem>>, vector<1x1x256xbf16>
    %104 = vector.shape_cast %103 : vector<1x1x256xbf16> to vector<1x256xbf16>
    %105 = vector.shape_cast %102 : vector<1x256xbf16> to vector<1x1x256xbf16>
    tpu.vector_store %arg13[%c0_41, %c2, %c0_42], %105 {strides = array<i32>} : memref<1x3x256xbf16, #tpu.memory_space<vmem>>, vector<1x1x256xbf16>,
    %106 = arith.truncf %95 : vector<1x16x16xf32> to vector<1x16x16xbf16>
    "tpu.trace_start"() <{level = 10 : i32, message = "nqk,nkc->nqc"}> : () -> ()
    %cst_43 = arith.constant dense<0.000000e+00> : vector<1x16x32xf32>
    %107 = tpu.matmul %106, %79, %cst_43 {dimension_numbers = #tpu.dot_dimension_numbers<[2], [1], [1], [2], [0, 0, 0, 1, 1, 2], [0], [0]>} : vector<1x16x16xbf16>, vector<1x16x32xbf16>, vector<1x16x32xf32> -> vector<1x16x32xf32>
    %cst_44 = arith.constant 0.000000e+00 : f32
    "tpu.trace_stop"() : () -> ()
    %108 = vector.broadcast %cst_44 : f32 to vector<16x32xf32>
    %cst_45 = arith.constant 0.000000e+00 : f32
    %109 = vector.broadcast %cst_45 : f32 to vector<1x2x32xf32>
    %110 = vector.extract_strided_slice %107 {offsets = [0, 0, 0], sizes = [1, 14, 32], strides = [1, 1, 1]} : vector<1x16x32xf32> to vector<1x14x32xf32>
    %111 = tpu.concatenate %109, %110 in 1 : vector<1x2x32xf32>, vector<1x14x32xf32> -> vector<1x16x32xf32>
    %112 = vector.shape_cast %111 : vector<1x16x32xf32> to vector<16x32xf32>
    %113 = arith.truncf %112 : vector<16x32xf32> to vector<16x32xbf16>
    %c0_46 = arith.constant 0 : index
    %c0_47 = arith.constant 0 : index
    %c0_48 = arith.constant 0 : index
    %114 = vector.load %arg8[%c0_46, %c0_47, %c0_48] : memref<2x32x32xbf16, #tpu.memory_space<vmem>>, vector<1x32x32xbf16>
    %115 = vector.shape_cast %114 : vector<1x32x32xbf16> to vector<32x32xbf16>
    %cst_49 = arith.constant dense<0.000000e+00> : vector<16x32xf32>
    %116 = tpu.matmul %113, %115, %cst_49 {dimension_numbers = #tpu.dot_dimension_numbers<[1], [0], [0], [1], [0, 0, 1, 1], [], []>} : vector<16x32xbf16>, vector<32x32xbf16>, vector<16x32xf32> -> vector<16x32xf32>
    %117 = arith.addf %108, %116 : vector<16x32xf32>
    %118 = vector.shape_cast %107 : vector<1x16x32xf32> to vector<16x32xf32>
    %119 = arith.truncf %118 : vector<16x32xf32> to vector<16x32xbf16>
    %c1_50 = arith.constant 1 : index
    %c0_51 = arith.constant 0 : index
    %c0_52 = arith.constant 0 : index
    %120 = vector.load %arg8[%c1_50, %c0_51, %c0_52] : memref<2x32x32xbf16, #tpu.memory_space<vmem>>, vector<1x32x32xbf16>
    %121 = vector.shape_cast %120 : vector<1x32x32xbf16> to vector<32x32xbf16>
    %cst_53 = arith.constant dense<0.000000e+00> : vector<16x32xf32>
    %122 = tpu.matmul %119, %121, %cst_53 {dimension_numbers = #tpu.dot_dimension_numbers<[1], [0], [0], [1], [0, 0, 1, 1], [], []>} : vector<16x32xbf16>, vector<32x32xbf16>, vector<16x32xf32> -> vector<16x32xf32>
    %123 = arith.addf %117, %122 : vector<16x32xf32>
    %c0_54 = arith.constant 0 : index
    %c0_55 = arith.constant 0 : index
    %124 = vector.load %arg9[%c0_54, %c0_55] : memref<1x32xf32, #tpu.memory_space<vmem>>, vector<1x32xf32>
    %125 = vector.broadcast %124 : vector<1x32xf32> to vector<16x32xf32>
    %126 = arith.addf %123, %125 : vector<16x32xf32>
    %cst_56 = arith.constant 0.000000e+00 : f32
    %127 = vector.broadcast %cst_56 : f32 to vector<16x32xf32>
    %128 = arith.maximumf %126, %127 : vector<16x32xf32>
    %129 = vector.shape_cast %128 : vector<16x32xf32> to vector<1x16x32xf32>
    %130 = arith.addf %129, %65 : vector<1x16x32xf32>
    %cst_57 = arith.constant 0.000000e+00 : f32
    %131 = vector.broadcast %cst_57 : f32 to vector<1x16x32xf32>
    %132 = arith.maximumf %130, %131 : vector<1x16x32xf32>
    %133 = vector.shape_cast %132 : vector<1x16x32xf32> to vector<16x32xf32>
    %134 = arith.truncf %133 : vector<16x32xf32> to vector<16x32xbf16>
    %c0_58 = arith.constant 0 : index
    %c0_59 = arith.constant 0 : index
    %135 = vector.load %arg10[%c0_58, %c0_59] : memref<32x128xbf16, #tpu.memory_space<vmem>>, vector<32x128xbf16>
    %cst_60 = arith.constant dense<0.000000e+00> : vector<16x128xf32>
    %136 = tpu.matmul %134, %135, %cst_60 {dimension_numbers = #tpu.dot_dimension_numbers<[1], [0], [0], [1], [0, 0, 1, 1], [], []>} : vector<16x32xbf16>, vector<32x128xbf16>, vector<16x128xf32> -> vector<16x128xf32>
    %c0_61 = arith.constant 0 : index
    %c0_62 = arith.constant 0 : index
    %137 = vector.load %arg11[%c0_61, %c0_62] : memref<1x128xf32, #tpu.memory_space<vmem>>, vector<1x128xf32>
    %138 = vector.broadcast %137 : vector<1x128xf32> to vector<16x128xf32>
    %139 = arith.addf %136, %138 : vector<16x128xf32>
    %140 = vector.shape_cast %139 : vector<16x128xf32> to vector<1x16x128xf32>
    %c0_63 = arith.constant 0 : index
    %c0_64 = arith.constant 0 : index
    %c0_65 = arith.constant 0 : index
    %141 = vector.load %arg12[%c0_63, %c0_64, %c0_65] : memref<1x16x128xf32, #tpu.memory_space<vmem>>, vector<1x16x128xf32>
    tpu.vector_store %arg12[%c0_63, %c0_64, %c0_65], %140 {strides = array<i32>} : memref<1x16x128xf32, #tpu.memory_space<vmem>>, vector<1x16x128xf32>,
    return
  }
  func.func @transform_0(%arg0: i32) -> (i32, i32, i32) {
    %c0_i32 = arith.constant 0 : i32
    %c0_i32_0 = arith.constant 0 : i32
    %c0_i32_1 = arith.constant 0 : i32
    return %arg0, %c0_i32, %c0_i32_0 : i32, i32, i32
  }
  func.func @transform_1(%arg0: i32) -> (i32, i32) {
    %c0_i32 = arith.constant 0 : i32
    %c0_i32_0 = arith.constant 0 : i32
    %c0_i32_1 = arith.constant 0 : i32
    return %c0_i32, %c0_i32_0 : i32, i32
  }
  func.func @transform_2(%arg0: i32) -> (i32, i32) {
    %c0_i32 = arith.constant 0 : i32
    %c0_i32_0 = arith.constant 0 : i32
    %c0_i32_1 = arith.constant 0 : i32
    return %c0_i32, %c0_i32_0 : i32, i32
  }
  func.func @transform_3(%arg0: i32) -> (i32, i32, i32) {
    %c0_i32 = arith.constant 0 : i32
    %c0_i32_0 = arith.constant 0 : i32
    %c0_i32_1 = arith.constant 0 : i32
    %c0_i32_2 = arith.constant 0 : i32
    return %c0_i32, %c0_i32_0, %c0_i32_1 : i32, i32, i32
  }
  func.func @transform_4(%arg0: i32) -> (i32, i32) {
    %c0_i32 = arith.constant 0 : i32
    %c0_i32_0 = arith.constant 0 : i32
    %c0_i32_1 = arith.constant 0 : i32
    return %c0_i32, %c0_i32_0 : i32, i32
  }
  func.func @transform_5(%arg0: i32) -> (i32, i32) {
    %c0_i32 = arith.constant 0 : i32
    %c0_i32_0 = arith.constant 0 : i32
    %c0_i32_1 = arith.constant 0 : i32
    return %c0_i32, %c0_i32_0 : i32, i32
  }
  func.func @transform_6(%arg0: i32) -> (i32, i32) {
    %c0_i32 = arith.constant 0 : i32
    %c0_i32_0 = arith.constant 0 : i32
    %c0_i32_1 = arith.constant 0 : i32
    return %c0_i32, %c0_i32_0 : i32, i32
  }
  func.func @transform_7(%arg0: i32) -> (i32, i32, i32) {
    %c0_i32 = arith.constant 0 : i32
    %c0_i32_0 = arith.constant 0 : i32
    %c0_i32_1 = arith.constant 0 : i32
    %c0_i32_2 = arith.constant 0 : i32
    return %c0_i32, %c0_i32_0, %c0_i32_1 : i32, i32, i32
  }
  func.func @transform_8(%arg0: i32) -> (i32, i32) {
    %c0_i32 = arith.constant 0 : i32
    %c0_i32_0 = arith.constant 0 : i32
    %c0_i32_1 = arith.constant 0 : i32
    return %c0_i32, %c0_i32_0 : i32, i32
  }
  func.func @transform_9(%arg0: i32) -> (i32, i32) {
    %c0_i32 = arith.constant 0 : i32
    %c0_i32_0 = arith.constant 0 : i32
    %c0_i32_1 = arith.constant 0 : i32
    return %c0_i32, %c0_i32_0 : i32, i32
  }
  func.func @transform_10(%arg0: i32) -> (i32, i32) {
    %c0_i32 = arith.constant 0 : i32
    %c0_i32_0 = arith.constant 0 : i32
    %c0_i32_1 = arith.constant 0 : i32
    return %c0_i32, %c0_i32_0 : i32, i32
  }
  func.func @transform_11(%arg0: i32) -> (i32, i32, i32) {
    %c0_i32 = arith.constant 0 : i32
    %c0_i32_0 = arith.constant 0 : i32
    %c0_i32_1 = arith.constant 0 : i32
    return %arg0, %c0_i32, %c0_i32_0 : i32, i32, i32
  }
  func.func @transform_12(%arg0: i32) -> (i32, i32, i32) {
    %c0_i32 = arith.constant 0 : i32
    %c0_i32_0 = arith.constant 0 : i32
    %c0_i32_1 = arith.constant 0 : i32
    return %arg0, %c0_i32, %c0_i32_0 : i32, i32, i32
  }
}

</mosaic_0001>

<bundles_post_ra>
// kernel: tcanet_forward.1
= control target key start
LH: loop header
LB: loop body
LE: loop exit
PB: predicated region body
PF: predicated region fallthrough
CT: control target
= control target key end

     0   :  { %s2610_s0 = inlined_call_operand.vmem [shape: f32[2,16,32], index: 0, kind: input, shape index: {}]   ;;  %s2611_s1 = inlined_call_operand.vmem [shape: bf16[32,64], index: 1, kind: input, shape index: {}]   ;;  %s2612_s2 = inlined_call_operand.vmem [shape: f32[1,64], index: 2, kind: input, shape index: {}]   ;;  %s2613_s3 = inlined_call_operand.vmem [shape: bf16[2,32,32], index: 3, kind: input, shape index: {}]   ;;  %s2614_s4 = inlined_call_operand.vmem [shape: f32[1,32], index: 4, kind: input, shape index: {}]   ;;  %s2615_s5 = inlined_call_operand.vmem [shape: bf16[32,64], index: 5, kind: input, shape index: {}]   ;;  %s2616_s6 = inlined_call_operand.vmem [shape: f32[1,64], index: 6, kind: input, shape index: {}]   ;;  %s2617_s7 = inlined_call_operand.vmem [shape: bf16[2,32,32], index: 7, kind: input, shape index: {}]   ;;  %s2618_s8 = inlined_call_operand.vmem [shape: f32[1,32], index: 8, kind: input, shape index: {}]   ;;  %s2619_s9 = inlined_call_operand.vmem [shape: bf16[32,128], index: 9, kind: input, shape index: {}]   ;;  %s2620_s10 = inlined_call_operand.vmem [shape: f32[1,128], index: 10, kind: input, shape index: {}]   ;;  %s2621_s11 = inlined_call_operand.hbm [shape: f32[2,16,128], index: 11, kind: output, shape index: {0}]   ;;  %s2622_s12 = inlined_call_operand.vmem [shape: bf16[2,3,256], index: 12, kind: output, shape index: {1}]  }
   0x1   :  { %2626 = sst [smem:[#allocation5_spill]] %s2610_s0 }
   0x2   :  { %2627 = sst [smem:[#allocation6_spill]] %s2611_s1 }
   0x3   :  { %18 = vsyncpa [#allocation3], 0 }
   0x4   :  { %20 = vsyncpa [#allocation3 + $0x1], 0  ;;  %s2163_s21 = smov 0   ;;  %s2165_s22 = smov 0  }
   0x5   :  { %s2167_s23 = smov 0   ;;  %s2169_s24 = smov 0  }
   0x6 LB: > { %s2184_s25 = sadd.s32 4294967295, %s2082_s24   ;;  %s1706_s26 = sadd.s32 4294967294, %s2082_s24   ;;  %s2082_s24 = sphi %s2169_s24, %s2641_s24   ;;  %s2078_s23 = sphi %s2167_s23, %s2640_s23   ;;  %s2074_s22 = sphi %s2165_s22, %s2639_s22   ;;  %s2070_s21 = sphi %s2163_s21, %s2638_s21  }
   0x7   : > { %s2188_s27 = sadd.s32 1, %s2082_s24   ;;  %s269_s28 = sadd.s32 1, %s2078_s23 }
   0x8   : > { %s266_s29 = ssub.s32 %s2082_s24, %s2188_s27  ;;  %p279_p0 = scmp.ne.s32.totalorder %s2078_s23, %s2074_s22 }
   0x9   : > { %p267_p1 = scmp.eq.s32.totalorder %s266_s29, 0  ;;  %p280_p2 = scmp.eq.s32.totalorder %s2184_s25, 1 }
   0xa   : > { %p285_p3 = scmp.ne.s32.totalorder %s2074_s22, %s2070_s21  ;;  %p286_p4 = scmp.eq.s32.totalorder %s1706_s26, 1 }
   0xb   : > { %s2199_s30 = scalar_select %p267_p1, %s2078_s23, %s269_s28  }
   0xc   : > { %p2201_p5 = por %p280_p2, %p279_p0  ;;  %p2205_p6 = por %p286_p4, %p285_p3 }
   0xd   : > { %p1709_p7 = scmp.ge.s32.totalorder %s2082_s24, 1  ;;  %p368_p8 = scmp.lt.s32.totalorder %s2082_s24, 3 }
   0xf   : > { %p369_p9 = pnand %p1709_p7, %p368_p8 }
  0x10   : > { %s2630_s1 = sld [smem:[#allocation6_spill]] (!%p369_p9)  ;;  %v2084_v1 = vmov (!%p369_p9), 0.0   ;;  %vm2085_vm0 = vmmov (!%p369_p9), 0   ;;  %p415_p10 = scmp.lt.s32.totalorder (!%p369_p9), %s2184_s25, 1  ;;  %vm459_vm1 = vcmask (!%p369_p9), 261120   ;;  %vm508_vm2 = vcmask (!%p369_p9), 130048  }
  0x11   : > { %372 = sbr.rel (%p369_p9) target bundleno = 2390 (0x956), region = 64  ;;  %1792 = vmatprep.subr.bf16.mxu0 (!%p369_p9), %v2084_v1  ;;  %1800 = vmatprep.subr.bf16.mxu1 (!%p369_p9), %v2084_v1  ;;  %s2631_s0 = sld [smem:[#allocation5_spill]] (!%p369_p9)  ;;  %v1715_v6 = vld [vmem:[%s2612_s2] ss:$0 sm:$0xff] (!%p369_p9)  ;;  %v428_v17 = vlaneseq (!%p369_p9)  ;;  %v2088_v53 = vmov (!%p369_p9), 1983009808  }
  0x12   : > { %1796 = vmatprep.mubr.msk.bf16.mxu0 (!%p369_p9), %vm2085_vm0, %v2084_v1  ;;  %1802 = vmatprep.mubr.msk.bf16.mxu1 (!%p369_p9), %vm2085_vm0, %v2084_v1  ;;  %s2086_s17 = smov (!%p369_p9), 112   ;;  %s2624_s18 = smov (!%p369_p9), 96   ;;  %v589_v54 = vunpack.c.l.s4 (!%p369_p9), %v2088_v53  ;;  %v2089_v55 = vmov (!%p369_p9), 1934713408   ;;  %vm773_vm5 = vcmask (!%p369_p9), 1040384   ;;  %vm743_vm6 = vcmask (!%p369_p9), 392192  }
  0x13   : > { %v2253_v18 = vshrl.u32 (!%p369_p9), %v428_v17, 7  ;;  %v2255_v19 = vand.u32 (!%p369_p9), 127, %v428_v17  ;;  %v604_v56 = vunpack.c.l.s4 (!%p369_p9), %v2089_v55  ;;  %s2623_s28 = smov (!%p369_p9), 16   ;;  %s2092_s15 = smov (!%p369_p9), 80   ;;  %v2001_v55 = vld [vmem:[%s2615_s5 + $0x8] sm:$0xff] (!%p369_p9)   ;;  %vm745_vm7 = vcmask (!%p369_p9), 523264  }
  0x14   : > { %v590_v57 = vunpack.c.0.s8 (!%p369_p9), %v589_v54  ;;  %v2000_v54 = vld [vmem:[%s2615_s5] sm:$0xff] (!%p369_p9)   ;;  %s2093_s16 = smov (!%p369_p9), 32   ;;  %vm774_vm8 = vsmask.f32 (!%p369_p9), 256  ;;  %vm776_vm9 = vcmask (!%p369_p9), 1042434   ;;  %vm747_vm10 = vcmask (!%p369_p9), 654336  }
  0x15   : > { %v2258_v20 = vadd.s32 (!%p369_p9), 8, %v2253_v18  ;;  %vm433_vm3 = vcmp.gt.s32.totalorder (!%p369_p9), %v2255_v19, %v2253_v18  ;;  %v605_v58 = vunpack.c.0.s8 (!%p369_p9), %v604_v56  ;;  %vm777_vm11 = vsmask.f32 (!%p369_p9), 2304  ;;  %vm775_vm14 = vmand (!%p369_p9), %vm773_vm5, %vm774_vm8 }
  0x16   : > { %v1994_v0 = vld [vmem:[%s2630_s1] sm:$0xff] (!%p369_p9)   ;;  %v1995_v2 = vld [vmem:[%s2630_s1 + $0x8] sm:$0xff] (!%p369_p9)   ;;  %v2275_v59 = vsub.s32 (!%p369_p9), %v590_v57, %v2253_v18  ;;  %vm749_vm12 = vcmask (!%p369_p9), 785408   ;;  %vm751_vm13 = vcmask (!%p369_p9), 916480   ;;  %vm778_vm15 = vmand (!%p369_p9), %vm776_vm9, %vm777_vm11  ;;  %vm1323_vm11 = vsmask.f32 (!%p369_p9), 1280 }
  0x17   : > { %1793 = vmatpush3.bf16.msra.mxu0 (!%p369_p9), %v1994_v0  ;;  %vm434_vm4 = vcmp.gt.s32.totalorder (!%p369_p9), %v2255_v19, %v2258_v20  ;;  %v2278_v61 = vsub.s32 (!%p369_p9), %v605_v58, %v2253_v18  ;;  %vm779_vm8 = vmor (!%p369_p9), %vm778_vm15, %vm775_vm14  ;;  %vm1325_vm14 = vcmask (!%p369_p9), 1043459   ;;  %vm1326_vm15 = vsmask.f32 (!%p369_p9), 3328 }
  0x18   : > { %1794 = vmatprep.subr.bf16.mxu0 %v2084_v1  ;;  %s2226_s19 = scalar_select %p415_p10, %s2184_s25, 1 }
  0x1a   : > { %s1760_s20 = sshll.u32 %s2226_s19, 4  ;;  %s1761_s26 = sshll.u32 %s2226_s19, 2 }
  0x1b   : > { %1795 = vmatpush3.bf16.msra.mxu0 %v1995_v2  ;;  %s419_s29 = scalar_lea.vmem %s2631_s0, %s1760_s20  ;;  %s2094_s20 = smov 64  }
  0x1c   : > { %1806 = vmatprep.subr.bf16.mxu0 %v2084_v1  ;;  %v2233_v3 = vld [vmem:[%s419_s29] sm:$0xff]  ;;  %v2235_v4 = vld [vmem:[%s419_s29 + $0x8] sm:$0xff]  ;;  %s2091_s29 = smov 48   ;;  %s2434_s19 = scalar_lea.vmem %s2622_s12, %s1761_s26 }
  0x1d   : > { %v435_v5 = vpack.c.bf16 %v2235_v4, %v2233_v3  ;;  %s2633_s26 = smov 16   ;;  %s1762_s0 = sshll.u32 %s2184_s25, 8 }
  0x1f   : > { %1797 = vmatmul.mubr.msk.bf16.vlgmr.msra.gmra.mrb[0].mxu0 %vm459_vm1, %v435_v5 }
  0x20   : > { %1808 = vmatprep.mubr.msk.bf16.mxu0 %vm2085_vm0, %v2084_v1 }
  0xf2   : > { %v497_v7 = vpop.f32.mrb[0].mxu0 }
  0xf3   : > { %v1798_v8 = vpop.f32.mrb[1].mxu0  ;;  %v498_v10 = vadd.f32 %v1715_v6, %v497_v7 }
  0xf4   : > { %v500_v9 = vpop.f32.mrb[2].mxu0 }
  0xf5   : > { %v501_v11 = vadd.f32 %v1715_v6, %v500_v9  ;;  %v1799_v12 = vpop.f32.mrb[3].mxu0 }
  0xf7   : > { %v504_v13 = vpack.c.bf16 %v501_v11, %v498_v10 }
  0xf9   : > { %506 = vrot.lane.b32.xlu0 %v504_v13, %s2086_s17 }
  0xfd   : > { %784 = vrot.lane.b32.xlu0 %v504_v13, %s2624_s18 }
 0x16b   : > { %v507_v14 = vpop.permute.xlu0 %506 }
 0x16c   : > { %v513_v15 = vsel %vm508_vm2, %v507_v14, 0 }
 0x16d   : > { %1801 = vmatpush3.bf16.xpose.msra.mxu1 %v513_v15 }
 0x16e   : > { %1812 = vmatprep.subr.bf16.mxu1 %v2084_v1 }
 0x16f   : > { %v785_v16 = vpop.permute.xlu0 %784 }
 0x170   : > { %1807 = vmatpush3.bf16.msra.mxu0 %v785_v16 }
 0x171   : > { %1820 = vmatprep.subr.bf16.mxu0 %v2084_v1 }
 0x174   : > { %1803 = vmatmul.mubr.msk.bf16.vlgmr.msra.gmra.mrb[0].mxu1 %vm508_vm2, %v504_v13 }
 0x175   : > { %1816 = vmatprep.mubr.msk.bf16.mxu1 %vm2085_vm0, %v2084_v1 }
 0x247   : > { %v549_v21 = vpop.f32.mrb[0].mxu1 }
 0x248   : > { %v556_v22 = vsel %vm433_vm3, -1e+30, %v549_v21  ;;  %v1804_v23 = vpop.f32.mrb[1].mxu1 }
 0x249   : > { %v558_v24 = vmul.f32 0.25, %v556_v22  ;;  %v552_v25 = vpop.f32.mrb[2].mxu1 }
 0x24a   : > { %v557_v26 = vsel %vm434_vm4, -1e+30, %v552_v25  ;;  %v1805_v27 = vpop.f32.mrb[3].mxu1 }
 0x24b   : > { %v559_v28 = vmul.f32 0.25, %v557_v26  ;;  %v560_v29 = vsel %vm508_vm2, %v558_v24, -inf }
 0x24d   : > { %v561_v30 = vsel %vm508_vm2, %v559_v28, -inf }
 0x24e   : > { %v562_v31 = vmax.f32 %v560_v29, %v561_v30 }
 0x250   : > { %v563_v32 = vrot.slane %v562_v31, 4 }
 0x252   : > { %v564_v33 = vmax.f32 %v562_v31, %v563_v32 }
 0x254   : > { %v565_v34 = vrot.slane %v564_v33, 2 }
 0x256   : > { %v566_v35 = vmax.f32 %v564_v33, %v565_v34  ;;  %v1996_v33 = vld [vmem:[%s2613_s3 + $0x10] sm:$0xff]  }
 0x257   : > { %1813 = vmatpush3.bf16.msra.mxu1 %v1996_v33 }
 0x258   : > { %v567_v36 = vrot.slane %v566_v35, 1  ;;  %1814 = vmatprep.subr.bf16.mxu1 %v2084_v1 }
 0x25a   : > { %v568_v37 = vmax.f32 %v566_v35, %v567_v36 }
 0x25c   : > { %v569_v38 = vsub.f32 %v558_v24, %v568_v37  ;;  %v570_v39 = vsub.f32 %v559_v28, %v568_v37 }
 0x25e   : > { %v571_v40 = vmul.f32 1.442695, %v569_v38  ;;  %v573_v41 = vmul.f32 1.442695, %v570_v39 }
 0x260   : > { %2008 = vpow2.f32 %v571_v40 }
 0x261   : > { %2010 = vpow2.f32 %v573_v41  ;;  %v1997_v41 = vld [vmem:[%s2613_s3] sm:$0xff]  }
 0x26a   : > { %v2009_v42 = vpop.eup %2008 }
 0x26b   : > { %v2011_v43 = vpop.eup %2010  ;;  %v575_v44 = vsel %vm508_vm2, %v2009_v42, 0.0 }
 0x26c   : > { %v576_v45 = vsel %vm508_vm2, %v2011_v43, 0.0 }
 0x26d   : > { %v577_v46 = vadd.f32 %v576_v45, %v575_v44 }
 0x26f   : > { %v578_v47 = vrot.slane %v577_v46, 4 }
 0x271   : > { %v579_v48 = vadd.f32 %v578_v47, %v577_v46 }
 0x273   : > { %v580_v49 = vrot.slane %v579_v48, 2 }
 0x275   : > { %v581_v50 = vadd.f32 %v580_v49, %v579_v48 }
 0x277   : > { %v582_v51 = vrot.slane %v581_v50, 1 }
 0x279   : > { %v583_v52 = vadd.f32 %v582_v51, %v581_v50 }
 0x27b   : > { %2012 = vrcp.f32 %v583_v52 }
 0x285   : > { %v2013_v60 = vpop.eup %2012 }
 0x286   : > { %v586_v62 = vmul.f32 %v2013_v60, %v2011_v43  ;;  %v585_v63 = vmul.f32 %v2013_v60, %v2009_v42  ;;  %v1998_v42 = vld [vmem:[%s2613_s3 + $0x18] sm:$0xff]   ;;  %v1999_v43 = vld [vmem:[%s2613_s3 + $0x8] sm:$0xff]  }
 0x287   : > { %1815 = vmatpush3.bf16.msra.mxu1 %v1998_v42 }
 0x288   : > { %v783_v0 = vpack.c.bf16 %v586_v62, %v585_v63  ;;  %v594_v2 = vrot.slane %v585_v63, %v2275_v59  ;;  %v643_v5 = vrot.slane %v586_v62, %v2275_v59  ;;  %v587_v6 = vcombine.high %v585_v63, %v2084_v1  ;;  %1828 = vmatprep.subr.bf16.mxu1 %v2084_v1  ;;  %v1732_v63 = vld [vmem:[%s2614_s4] ss:$0 sm:$0xff] }
 0x289   : > { %v636_v7 = vcombine.high %v586_v62, %v2084_v1 }
 0x28a   : > { %1809 = vmatmul.mubr.msk.bf16.vlgmr.msra.gmra.mrb[4].mxu0 %vm508_vm2, %v783_v0  ;;  %v2286_v8 = vrot.slane %v594_v2, %v2278_v61  ;;  %v2289_v9 = vrot.slane %v643_v5, %v2278_v61  ;;  %v602_v10 = vcombine.high %v594_v2, %v2084_v1  ;;  %v651_v11 = vcombine.high %v643_v5, %v2084_v1 }
 0x28b   : > { %v601_v12 = vrot.slane %v587_v6, %v2275_v59  ;;  %v650_v13 = vrot.slane %v636_v7, %v2275_v59  ;;  %1824 = vmatprep.mubr.msk.bf16.mxu0 %vm2085_vm0, %v2084_v1  ;;  %1821 = vmatpush3.bf16.msra.mxu0 %v1997_v41 }
 0x28c   : > { %v632_v14 = vcombine.high %v2286_v8, %v2084_v1  ;;  %v681_v15 = vcombine.high %v2289_v9, %v2084_v1  ;;  %v2302_v16 = vrot.slane %v602_v10, %v2278_v61  ;;  %v2305_v17 = vrot.slane %v651_v11, %v2278_v61  ;;  %1822 = vmatprep.subr.bf16.mxu0 %v2084_v1 }
 0x28d   : > { %v2308_v21 = vrot.slane %v601_v12, %v2278_v61  ;;  %v2311_v22 = vrot.slane %v650_v13, %v2278_v61  ;;  %v617_v23 = vcombine.high %v601_v12, %v2084_v1  ;;  %v666_v24 = vcombine.high %v650_v13, %v2084_v1 }
 0x28e   : > { %v1924_v25 = vpack.i.bf16 %v681_v15, %v632_v14  ;;  %v633_v26 = vcombine.high %v2302_v16, %v2084_v1  ;;  %v682_v27 = vcombine.high %v2305_v17, %v2084_v1  ;;  %v1929_v28 = vpack.i.bf16 %v2305_v17, %v2302_v16 }
 0x28f   : > { %v634_v29 = vcombine.high %v2308_v21, %v2084_v1  ;;  %v683_v30 = vcombine.high %v2311_v22, %v2084_v1  ;;  %v2326_v31 = vrot.slane %v617_v23, %v2278_v61  ;;  %v2329_v32 = vrot.slane %v666_v24, %v2278_v61  ;;  %1823 = vmatpush3.bf16.msra.mxu0 %v1999_v43 }
 0x290   : > { %1925 = vrot.lane.b32.xlu0 %v1924_v25, %s2623_s28  ;;  %v1934_v34 = vpack.i.bf16 %v682_v27, %v633_v26  ;;  %v1939_v38 = vpack.i.bf16 %v2311_v22, %v2308_v21  ;;  %1836 = vmatprep.subr.bf16.mxu0 %v2084_v1  ;;  %s2632_s28 = smov 96  }
 0x291   : > { %v1944_v35 = vpack.i.bf16 %v683_v30, %v634_v29  ;;  %v635_v36 = vcombine.high %v2326_v31, %v2084_v1  ;;  %v684_v37 = vcombine.high %v2329_v32, %v2084_v1  ;;  %v1949_v39 = vpack.i.bf16 %v2329_v32, %v2326_v31 }
 0x293   : > { %v1954_v40 = vpack.i.bf16 %v684_v37, %v635_v36 }
 0x294   : > { %1935 = vrot.lane.b32.xlu0 %v1934_v34, %s2091_s29 }
 0x298   : > { %1945 = vrot.lane.b32.xlu0 %v1944_v35, %s2092_s15 }
 0x29c   : > { %1955 = vrot.lane.b32.xlu0 %v1954_v40, %s2086_s17 }
 0x302   : > { %v1926_v35 = vpop.permute.xlu0 %1925 }
 0x303   : > { %v1928_v17 = vunpack.i.h.bf16 %v1926_v35 }
 0x305   : > { %v753_v31 = vsel %vm508_vm2, %v2289_v9, %v1928_v17 }
 0x306   : > { %v1936_v40 = vpop.permute.xlu0 %1935 }
 0x307   : > { %v1938_v43 = vunpack.i.h.bf16 %v1936_v40 }
 0x30a   : > { %v1946_v22 = vpop.permute.xlu0 %1945 }
 0x35d   : > { %v824_v44 = vpop.f32.mrb[4].mxu0 }
 0x35e   : > { %v834_v45 = vrot.slane %v824_v44, 7  ;;  %v1810_v46 = vpop.f32.mrb[5].mxu0 }
 0x35f   : > { %v827_v47 = vpop.f32.mrb[6].mxu0 }
 0x360   : > { %v835_v48 = vrot.slane %v827_v47, 7  ;;  %v845_v49 = vpack.c.bf16 %v827_v47, %v824_v44  ;;  %v1811_v50 = vpop.f32.mrb[7].mxu0  ;;  %v839_v51 = vsel %vm773_vm5, 0.0, %v834_v45  ;;  %v1937_v44 = vunpack.i.l.bf16 %v1936_v40 }
 0x362   : > { %v836_v52 = vsel %vm773_vm5, %v834_v45, %v835_v48  ;;  %1817 = vmatmul.mubr.msk.bf16.vlgmr.msra.gmra.mrb[4].mxu1 %vm459_vm1, %v845_v49  ;;  %v1956_v48 = vpop.permute.xlu0 %1955 }
 0x363   : > { %v840_v53 = vpack.c.bf16 %v836_v52, %v839_v51  ;;  %1832 = vmatprep.mubr.msk.bf16.mxu1 %vm2085_vm0, %v2084_v1  ;;  %1829 = vmatpush3.bf16.msra.mxu1 %v2000_v54  ;;  %v1948_v51 = vunpack.i.h.bf16 %v1946_v22  ;;  %v1947_v52 = vunpack.i.l.bf16 %v1946_v22 }
 0x364   : > { %1830 = vmatprep.subr.bf16.mxu1 %v2084_v1 }
 0x365   : > { %1825 = vmatmul.mubr.msk.bf16.vlgmr.msra.gmra.mrb[8].mxu0 %vm459_vm1, %v840_v53 }
 0x366   : > { %1838 = vmatprep.mubr.msk.bf16.mxu0 %vm2085_vm0, %v2084_v1 }
 0x367   : > { %1831 = vmatpush3.bf16.msra.mxu1 %v2001_v55 }
 0x368   : > { %1842 = vmatprep.subr.bf16.mxu1 %v2084_v1 }
 0x435   : > { %v900_v56 = vpop.f32.mrb[4].mxu1 }
 0x436   : > { %v1818_v57 = vpop.f32.mrb[5].mxu1 }
 0x437   : > { %v903_v58 = vpop.f32.mrb[6].mxu1  ;;  %v1957_v57 = vunpack.i.l.bf16 %v1956_v48 }
 0x438   : > { %v1819_v60 = vpop.f32.mrb[7].mxu1  ;;  %v956_v62 = vpop.f32.mrb[8].mxu0 }
 0x439   : > { %v957_v0 = vadd.f32 %v956_v62, %v900_v56  ;;  %v1826_v2 = vpop.f32.mrb[9].mxu0  ;;  %v1958_v56 = vunpack.i.h.bf16 %v1956_v48 }
 0x43a   : > { %v959_v5 = vpop.f32.mrb[10].mxu0 }
 0x43b   : > { %v970_v6 = vadd.f32 %v1732_v63, %v957_v0  ;;  %v960_v7 = vadd.f32 %v959_v5, %v903_v58  ;;  %v1827_v10 = vpop.f32.mrb[11].mxu0 }
 0x43d   : > { %v972_v11 = vmax.f32 %v970_v6, 0.0  ;;  %v971_v12 = vadd.f32 %v1732_v63, %v960_v7  ;;  %v780_v6 = vld [vmem:[%s2434_s19] sm:$0x5] }
 0x43f   : > { %v2379_v13 = vadd.f32 %v972_v11, %v2233_v3  ;;  %v973_v14 = vmax.f32 %v971_v12, 0.0  ;;  %v1733_v3 = vld [vmem:[%s2616_s6] ss:$0 sm:$0xff] }
 0x441   : > { %v2382_v15 = vadd.f32 %v973_v14, %v2235_v4  ;;  %v976_v23 = vmax.f32 %v2379_v13, 0.0 }
 0x443   : > { %v977_v24 = vmax.f32 %v2382_v15, 0.0 }
 0x445   : > { %v978_v25 = vpack.c.bf16 %v977_v24, %v976_v23 }
 0x447   : > { %1833 = vmatmul.mubr.msk.bf16.vlgmr.msra.gmra.mrb[8].mxu1 %vm459_vm1, %v978_v25 }
 0x448   : > { %1844 = vmatprep.mubr.msk.bf16.mxu1 %vm2085_vm0, %v2084_v1 }
 0x51a   : > { %v1039_v4 = vpop.f32.mrb[8].mxu1 }
 0x51b   : > { %v1834_v26 = vpop.f32.mrb[9].mxu1  ;;  %v1040_v29 = vadd.f32 %v1733_v3, %v1039_v4 }
 0x51c   : > { %v1042_v27 = vpop.f32.mrb[10].mxu1 }
 0x51d   : > { %v1043_v30 = vadd.f32 %v1733_v3, %v1042_v27  ;;  %v1835_v33 = vpop.f32.mrb[11].mxu1 }
 0x51f   : > { %v1046_v34 = vpack.c.bf16 %v1043_v30, %v1040_v29 }
 0x521   : > { %1048 = vrot.lane.b32.xlu1 %v1046_v34, %s2086_s17 }
 0x525   : > { %1333 = vrot.lane.b32.xlu1 %v1046_v34, %s2632_s28 }
 0x529   : > { %1930 = vrot.lane.b32.xlu1 %v1929_v28, %s2093_s16  ;;  %v1927_v28 = vunpack.i.l.bf16 %v1926_v35 }
 0x52b   : > { %v741_v32 = vsel %vm508_vm2, %v2286_v8, %v1927_v28 }
 0x52d   : > { %1940 = vrot.lane.b32.xlu1 %v1939_v38, %s2094_s20 }
 0x531   : > { %1950 = vrot.lane.b32.xlu1 %v1949_v39, %s2632_s28 }
 0x593   : > { %v1049_v36 = vpop.permute.xlu1 %1048 }
 0x594   : > { %v1054_v37 = vsel %vm508_vm2, %v1049_v36, 0 }
 0x595   : > { %1837 = vmatpush3.bf16.xpose.msra.mxu0 %v1054_v37 }
 0x596   : > { %1848 = vmatprep.subr.bf16.mxu0 %v2084_v1 }
 0x597   : > { %v1334_v16 = vpop.permute.xlu1 %1333 }
 0x598   : > { %1843 = vmatpush3.bf16.msra.mxu1 %v1334_v16 }
 0x599   : > { %1856 = vmatprep.subr.bf16.mxu1 %v2084_v1 }
 0x59b   : > { %v1931_v21 = vpop.permute.xlu1 %1930 }
 0x59c   : > { %v1933_v38 = vunpack.i.h.bf16 %v1931_v21  ;;  %v1932_v41 = vunpack.i.l.bf16 %v1931_v21  ;;  %1839 = vmatmul.mubr.msk.bf16.vlgmr.msra.gmra.mrb[12].mxu0 %vm508_vm2, %v1046_v34 }
 0x59d   : > { %1852 = vmatprep.mubr.msk.bf16.mxu0 %vm2085_vm0, %v2084_v1 }
 0x59e   : > { %v754_v39 = vsel %vm459_vm1, %v753_v31, %v1933_v38  ;;  %v742_v42 = vsel %vm459_vm1, %v741_v32, %v1932_v41 }
 0x59f   : > { %v1941_v45 = vpop.permute.xlu1 %1940  ;;  %v744_v9 = vsel %vm743_vm6, %v742_v42, %v1937_v44  ;;  %v755_v8 = vsel %vm743_vm6, %v754_v39, %v1938_v43 }
 0x5a0   : > { %v1943_v46 = vunpack.i.h.bf16 %v1941_v45  ;;  %v1942_v47 = vunpack.i.l.bf16 %v1941_v45 }
 0x5a2   : > { %v746_v49 = vsel %vm745_vm7, %v744_v9, %v1942_v47  ;;  %v756_v50 = vsel %vm745_vm7, %v755_v8, %v1943_v46 }
 0x5a3   : > { %v1951_v53 = vpop.permute.xlu1 %1950  ;;  %v748_v58 = vsel %vm747_vm10, %v746_v49, %v1947_v52  ;;  %v757_v60 = vsel %vm747_vm10, %v756_v50, %v1948_v51 }
 0x5a4   : > { %v1953_v54 = vunpack.i.h.bf16 %v1951_v53  ;;  %v1952_v55 = vunpack.i.l.bf16 %v1951_v53 }
 0x5a6   : > { %v750_v62 = vsel %vm749_vm12, %v748_v58, %v1952_v55  ;;  %v758_v63 = vsel %vm749_vm12, %v757_v60, %v1953_v54 }
 0x5a7   : > { %v752_v0 = vsel %vm751_vm13, %v750_v62, %v1957_v57  ;;  %v759_v2 = vsel %vm751_vm13, %v758_v63, %v1958_v56 }
 0x5a8   : > { %v1720_v5 = vpack.c.bf16 %v759_v2, %v752_v0 }
 0x5aa   : > { %v771_v7 = vrot.slane %v1720_v5, %v2275_v59 }
 0x5ac   : > { %v781_v10 = vsel %vm779_vm8, %v771_v7, %v780_v6 }
 0x5ad   : > { %782 = vst [vmem:[%s2434_s19] sm:$0x5] %v781_v10 }
 0x66f   : > { %v1090_v11 = vpop.f32.mrb[12].mxu0 }
 0x670   : > { %v1097_v12 = vsel %vm433_vm3, -1e+30, %v1090_v11  ;;  %v1840_v14 = vpop.f32.mrb[13].mxu0  ;;  %vm1312_vm3 = vsmask.f32 7938 }
 0x671   : > { %v1099_v25 = vmul.f32 0.25, %v1097_v12  ;;  %v1093_v3 = vpop.f32.mrb[14].mxu0 }
 0x672   : > { %v1098_v4 = vsel %vm434_vm4, -1e+30, %v1093_v3  ;;  %v1841_v26 = vpop.f32.mrb[15].mxu0  ;;  %vm1322_vm4 = vcmask 1041409  }
 0x673   : > { %v1100_v27 = vmul.f32 0.25, %v1098_v4  ;;  %v1101_v29 = vsel %vm508_vm2, %v1099_v25, -inf }
 0x675   : > { %v1102_v30 = vsel %vm508_vm2, %v1100_v27, -inf }
 0x676   : > { %v1103_v33 = vmax.f32 %v1101_v29, %v1102_v30 }
 0x678   : > { %v1104_v34 = vrot.slane %v1103_v33, 4 }
 0x67a   : > { %v1105_v35 = vmax.f32 %v1103_v33, %v1104_v34 }
 0x67c   : > { %v1106_v36 = vrot.slane %v1105_v35, 2 }
 0x67e   : > { %v1107_v37 = vmax.f32 %v1105_v35, %v1106_v36  ;;  %v2002_v35 = vld [vmem:[%s2617_s7 + $0x10] sm:$0xff]   ;;  %v2004_v36 = vld [vmem:[%s2617_s7 + $0x18] sm:$0xff]  }
 0x67f   : > { %1849 = vmatpush3.bf16.msra.mxu0 %v2002_v35  ;;  %v2006_v35 = vld [vmem:[%s2619_s9] sm:$0xff]  }
 0x680   : > { %v1108_v18 = vrot.slane %v1107_v37, 1  ;;  %1850 = vmatprep.subr.bf16.mxu0 %v2084_v1 }
 0x682   : > { %v1109_v40 = vmax.f32 %v1107_v37, %v1108_v18  ;;  %v2005_v37 = vld [vmem:[%s2617_s7 + $0x8] sm:$0xff]  }
 0x683   : > { %1851 = vmatpush3.bf16.msra.mxu0 %v2004_v36 }
 0x684   : > { %v1110_v16 = vsub.f32 %v1099_v25, %v1109_v40  ;;  %v1111_v17 = vsub.f32 %v1100_v27, %v1109_v40  ;;  %1864 = vmatprep.subr.bf16.mxu0 %v2084_v1 }
 0x686   : > { %v1112_v28 = vmul.f32 1.442695, %v1110_v16  ;;  %v1114_v21 = vmul.f32 1.442695, %v1111_v17 }
 0x688   : > { %2014 = vpow2.f32 %v1112_v28 }
 0x689   : > { %2016 = vpow2.f32 %v1114_v21 }
 0x692   : > { %v2015_v19 = vpop.eup %2014 }
 0x693   : > { %v2017_v20 = vpop.eup %2016  ;;  %v1116_v22 = vsel %vm508_vm2, %v2015_v19, 0.0 }
 0x694   : > { %v1117_v38 = vsel %vm508_vm2, %v2017_v20, 0.0 }
 0x695   : > { %v1118_v41 = vadd.f32 %v1117_v38, %v1116_v22 }
 0x697   : > { %v1119_v31 = vrot.slane %v1118_v41, 4 }
 0x699   : > { %v1120_v32 = vadd.f32 %v1119_v31, %v1118_v41 }
 0x69b   : > { %v1121_v39 = vrot.slane %v1120_v32, 2 }
 0x69d   : > { %v1122_v42 = vadd.f32 %v1121_v39, %v1120_v32 }
 0x69f   : > { %v1123_v43 = vrot.slane %v1122_v42, 1 }
 0x6a1   : > { %v1124_v44 = vadd.f32 %v1123_v43, %v1122_v42 }
 0x6a3   : > { %2018 = vrcp.f32 %v1124_v44 }
 0x6ad   : > { %v2019_v45 = vpop.eup %2018 }
 0x6ae   : > { %v1127_v46 = vmul.f32 %v2019_v45, %v2017_v20  ;;  %v1126_v47 = vmul.f32 %v2019_v45, %v2015_v19 }
 0x6b0   : > { %v1332_v9 = vpack.c.bf16 %v1127_v46, %v1126_v47  ;;  %v1135_v8 = vrot.slane %v1126_v47, %v2275_v59  ;;  %v1184_v48 = vrot.slane %v1127_v46, %v2275_v59  ;;  %v1128_v49 = vcombine.high %v1126_v47, %v2084_v1 }
 0x6b1   : > { %v1177_v50 = vcombine.high %v1127_v46, %v2084_v1 }
 0x6b2   : > { %1845 = vmatmul.mubr.msk.bf16.vlgmr.msra.gmra.mrb[12].mxu1 %vm508_vm2, %v1332_v9  ;;  %v1150_v51 = vrot.slane %v1135_v8, %v2278_v61  ;;  %v1199_v52 = vrot.slane %v1184_v48, %v2278_v61  ;;  %v1143_v53 = vcombine.high %v1135_v8, %v2084_v1  ;;  %v1192_v54 = vcombine.high %v1184_v48, %v2084_v1 }
 0x6b3   : > { %v1142_v55 = vrot.slane %v1128_v49, %v2275_v59  ;;  %v1191_v56 = vrot.slane %v1177_v50, %v2275_v59  ;;  %1860 = vmatprep.mubr.msk.bf16.mxu1 %vm2085_vm0, %v2084_v1 }
 0x6b4   : > { %v1173_v57 = vcombine.high %v1150_v51, %v2084_v1  ;;  %v1222_v58 = vcombine.high %v1199_v52, %v2084_v1  ;;  %v1157_v60 = vrot.slane %v1143_v53, %v2278_v61  ;;  %v1206_v62 = vrot.slane %v1192_v54, %v2278_v61 }
 0x6b5   : > { %v1165_v63 = vrot.slane %v1142_v55, %v2278_v61  ;;  %v1214_v0 = vrot.slane %v1191_v56, %v2278_v61  ;;  %v1158_v2 = vcombine.high %v1142_v55, %v2084_v1  ;;  %v1207_v5 = vcombine.high %v1191_v56, %v2084_v1 }
 0x6b6   : > { %v1959_v6 = vpack.i.bf16 %v1222_v58, %v1173_v57  ;;  %v1964_v7 = vpack.i.bf16 %v1206_v62, %v1157_v60  ;;  %v1174_v10 = vcombine.high %v1157_v60, %v2084_v1  ;;  %v1223_v11 = vcombine.high %v1206_v62, %v2084_v1 }
 0x6b7   : > { %v1969_v12 = vpack.i.bf16 %v1214_v0, %v1165_v63  ;;  %v1175_v14 = vcombine.high %v1165_v63, %v2084_v1  ;;  %v1224_v25 = vcombine.high %v1214_v0, %v2084_v1  ;;  %v1172_v3 = vrot.slane %v1158_v2, %v2278_v61 }
 0x6b8   : > { %1960 = vrot.lane.b32.xlu1 %v1959_v6, %s2633_s26  ;;  %1965 = vrot.lane.b32.xlu0 %v1964_v7, %s2093_s16  ;;  %v1974_v4 = vpack.i.bf16 %v1223_v11, %v1174_v10  ;;  %v1221_v26 = vrot.slane %v1207_v5, %v2278_v61  ;;  %v2003_v61 = vld [vmem:[%s2617_s7] sm:$0xff]   ;;  %s2567_s26 = scalar_lea.hbm %s2621_s11, %s1762_s0 }
 0x6b9   : > { %v1979_v27 = vpack.i.bf16 %v1224_v25, %v1175_v14  ;;  %v1176_v29 = vcombine.high %v1172_v3, %v2084_v1  ;;  %1857 = vmatpush3.bf16.msra.mxu1 %v2003_v61  ;;  %v1329_v6 = vld [vmem:[%s2434_s19] sm:$0xa]  ;;  %v1317_v11 = vld [vmem:[%s2434_s19] sm:$0x5]  ;;  %v2007_v61 = vld [vmem:[%s2619_s9 + $0x8] sm:$0xff]  }
 0x6ba   : > { %v1984_v30 = vpack.i.bf16 %v1221_v26, %v1172_v3  ;;  %v1225_v33 = vcombine.high %v1221_v26, %v2084_v1  ;;  %1858 = vmatprep.subr.bf16.mxu1 %v2084_v1 }
 0x6bc   : > { %1975 = vrot.lane.b32.xlu1 %v1974_v4, %s2091_s29  ;;  %1970 = vrot.lane.b32.xlu0 %v1969_v12, %s2094_s20  ;;  %v1989_v34 = vpack.i.bf16 %v1225_v33, %v1176_v29  ;;  %s405_s29 = sand.u32 1, %s2074_s22  }
 0x6bd   : > { %1859 = vmatpush3.bf16.msra.mxu1 %v2005_v37  ;;  %s1710_s20 = sshll.u32 %s405_s29, 4 }
 0x6c0   : > { %1980 = vrot.lane.b32.xlu1 %v1979_v27, %s2092_s15  ;;  %1985 = vrot.lane.b32.xlu0 %v1984_v30, %s2632_s28  ;;  %s2095_s15 = smov [#allocation2]  }
 0x6c1   : > { %s2024_s28 = sshll.u32 %s2095_s15, 4  ;;  %s2025_s28 = int_to_ptr.vmem [resolvable:$false] %s2024_s28 }
 0x6c2   : > { %s2026_s1 = scalar_lea.vmem %s2025_s28, 512 }
 0x6c4   : > { %1990 = vrot.lane.b32.xlu1 %v1989_v34, %s2086_s17  ;;  %s407_s17 = scalar_lea.vmem [#allocation2], %s1710_s20  ;;  %s2569_s20 = scalar_lea.sflag [#allocation3], %s405_s29 }
 0x72a   : > { %v1961_v18 = vpop.permute.xlu1 %1960  ;;  %v1966_v40 = vpop.permute.xlu0 %1965 }
 0x72b   : > { %v1963_v16 = vunpack.i.h.bf16 %v1961_v18  ;;  %v1962_v17 = vunpack.i.l.bf16 %v1961_v18  ;;  %v1968_v28 = vunpack.i.h.bf16 %v1966_v40  ;;  %v1967_v21 = vunpack.i.l.bf16 %v1966_v40 }
 0x72d   : > { %v1289_v19 = vsel %vm508_vm2, %v1199_v52, %v1963_v16  ;;  %v1282_v20 = vsel %vm508_vm2, %v1150_v51, %v1962_v17  ;;  %vm1314_vm2 = vsmask.f32 7946  ;;  %v1750_v17 = vld [vmem:[%s2618_s8] ss:$0 sm:$0xff] }
 0x72e   : > { %v1976_v22 = vpop.permute.xlu1 %1975  ;;  %v1971_v38 = vpop.permute.xlu0 %1970  ;;  %v1290_v32 = vsel %vm459_vm1, %v1289_v19, %v1968_v28  ;;  %v1283_v39 = vsel %vm459_vm1, %v1282_v20, %v1967_v21 }
 0x72f   : > { %v1978_v41 = vunpack.i.h.bf16 %v1976_v22  ;;  %v1977_v31 = vunpack.i.l.bf16 %v1976_v22  ;;  %v1973_v42 = vunpack.i.h.bf16 %v1971_v38  ;;  %v1972_v43 = vunpack.i.l.bf16 %v1971_v38 }
 0x731   : > { %v1291_v44 = vsel %vm743_vm6, %v1290_v32, %v1978_v41  ;;  %v1284_v45 = vsel %vm743_vm6, %v1283_v39, %v1977_v31  ;;  %vm2516_vm6 = vmand %vm773_vm5, %vm1312_vm3 }
 0x732   : > { %v1981_v46 = vpop.permute.xlu1 %1980  ;;  %v1986_v47 = vpop.permute.xlu0 %1985  ;;  %v1292_v48 = vsel %vm745_vm7, %v1291_v44, %v1973_v42  ;;  %v1285_v49 = vsel %vm745_vm7, %v1284_v45, %v1972_v43  ;;  %vm2521_vm7 = vmand %vm776_vm9, %vm1314_vm2  ;;  %v1751_v45 = vld [vmem:[%s2620_s10] ss:$0 sm:$0xff] }
 0x733   : > { %v1983_v9 = vunpack.i.h.bf16 %v1981_v46  ;;  %v1982_v8 = vunpack.i.l.bf16 %v1981_v46  ;;  %v1988_v50 = vunpack.i.h.bf16 %v1986_v47  ;;  %v1987_v51 = vunpack.i.l.bf16 %v1986_v47  ;;  %vm1324_vm5 = vmand %vm1322_vm4, %vm1323_vm11 }
 0x734   : > { %vm1316_vm9 = vmor %vm2521_vm7, %vm2516_vm6 }
 0x735   : > { %v1293_v52 = vsel %vm747_vm10, %v1292_v48, %v1983_v9  ;;  %v1286_v53 = vsel %vm747_vm10, %v1285_v49, %v1982_v8  ;;  %vm1327_vm10 = vmand %vm1325_vm14, %vm1326_vm15 }
 0x736   : > { %v1991_v54 = vpop.permute.xlu1 %1990  ;;  %v1294_v60 = vsel %vm749_vm12, %v1293_v52, %v1988_v50  ;;  %v1287_v62 = vsel %vm749_vm12, %v1286_v53, %v1987_v51  ;;  %vm1328_vm8 = vmor %vm1327_vm10, %vm1324_vm5  ;;  %vm1382_vm12 = vcmask 1041408  }
 0x737   : > { %v1993_v56 = vunpack.i.h.bf16 %v1991_v54  ;;  %v1992_v57 = vunpack.i.l.bf16 %v1991_v54 }
 0x739   : > { %v1295_v63 = vsel %vm751_vm13, %v1294_v60, %v1993_v56  ;;  %v1288_v0 = vsel %vm751_vm13, %v1287_v62, %v1992_v57 }
 0x73a   : > { %v1738_v2 = vpack.c.bf16 %v1295_v63, %v1288_v0 }
 0x73c   : > { %v1307_v5 = vrot.slane %v1738_v2, %v2275_v59 }
 0x73e   : > { %v1309_v7 = vshll.u32 %v1307_v5, 16  ;;  %v1320_v10 = vrot.slane %v1307_v5, 7 }
 0x740   : > { %v1318_v12 = vsel %vm1316_vm9, %v1309_v7, %v1317_v11  ;;  %v1330_v14 = vsel %vm1328_vm8, %v1320_v10, %v1329_v6 }
 0x741   : > { %1319 = vst [vmem:[%s2434_s19] sm:$0x5] %v1318_v12  ;;  %1331 = vst [vmem:[%s2434_s19] sm:$0xa] %v1330_v14  ;;  %s1616_s19 = sshll.u32 %s407_s17, 4  ;;  %s2562_s19 = int_to_ptr.vmem [resolvable:$true] %s1616_s19 }
 0x742   : > { %s2020_s25 = scalar_lea.vmem %s2562_s19, 256  ;;  %p2027_p0 = scmp.lt.s32.totalorder %s2562_s19, %s2025_s28 }
 0x743   : > { %p2021_p11 = scmp.ne.s32.totalorder %s2562_s19, %s2020_s25  ;;  %p2028_p1 = scmp.lt.s32.totalorder %s2026_s1, %s2020_s25 }
 0x745   : > { %p2022_p12 = pnand %p2021_p11, %p2201_p5  ;;  %p2029_p2 = por %p2028_p1, %p2027_p0 }
 0x747   : > { %p2023_p13 = pneg %p2022_p12 }
 0x749   : > { %p2030_p3 = pnand %p2029_p2, %p2023_p13 }
 0x785   : > { %v1373_v25 = vpop.f32.mrb[12].mxu1 }
 0x786   : > { %v1383_v3 = vrot.slane %v1373_v25, 6  ;;  %v1846_v4 = vpop.f32.mrb[13].mxu1 }
 0x787   : > { %v1376_v26 = vpop.f32.mrb[14].mxu1 }
 0x788   : > { %v1384_v27 = vrot.slane %v1376_v26, 6  ;;  %v1394_v29 = vpack.c.bf16 %v1376_v26, %v1373_v25  ;;  %v1847_v30 = vpop.f32.mrb[15].mxu1  ;;  %v1388_v33 = vsel %vm1382_vm12, 0.0, %v1383_v3 }
 0x78a   : > { %v1385_v34 = vsel %vm1382_vm12, %v1383_v3, %v1384_v27  ;;  %1853 = vmatmul.mubr.msk.bf16.vlgmr.msra.gmra.mrb[16].mxu0 %vm459_vm1, %v1394_v29 }
 0x78b   : > { %v1389_v59 = vpack.c.bf16 %v1385_v34, %v1388_v33  ;;  %1868 = vmatprep.mubr.msk.bf16.mxu0 %vm2085_vm0, %v2084_v1  ;;  %1865 = vmatpush3.bf16.msra.mxu0 %v2006_v35 }
 0x78c   : > { %1866 = vmatprep.subr.bf16.mxu0 %v2084_v1 }
 0x78d   : > { %1861 = vmatmul.mubr.msk.bf16.vlgmr.msra.gmra.mrb[16].mxu1 %vm459_vm1, %v1389_v59 }
 0x78f   : > { %1867 = vmatpush3.bf16.msra.mxu0 %v2007_v61 }
 0x85d   : > { %v1449_v36 = vpop.f32.mrb[16].mxu0 }
 0x85e   : > { %v1854_v37 = vpop.f32.mrb[17].mxu0 }
 0x85f   : > { %v1452_v18 = vpop.f32.mrb[18].mxu0 }
 0x860   : > { %v1855_v40 = vpop.f32.mrb[19].mxu0  ;;  %v1505_v16 = vpop.f32.mrb[16].mxu1 }
 0x861   : > { %v1506_v28 = vadd.f32 %v1505_v16, %v1449_v36  ;;  %v1862_v21 = vpop.f32.mrb[17].mxu1 }
 0x862   : > { %v1508_v19 = vpop.f32.mrb[18].mxu1 }
 0x863   : > { %v1519_v20 = vadd.f32 %v1750_v17, %v1506_v28  ;;  %v1509_v1 = vadd.f32 %v1508_v19, %v1452_v18  ;;  %v1863_v22 = vpop.f32.mrb[19].mxu1 }
 0x865   : > { %v1521_v38 = vmax.f32 %v1519_v20, 0.0  ;;  %v1520_v41 = vadd.f32 %v1750_v17, %v1509_v1 }
 0x867   : > { %v1523_v31 = vadd.f32 %v1521_v38, %v976_v23  ;;  %v1522_v32 = vmax.f32 %v1520_v41, 0.0 }
 0x869   : > { %v1524_v39 = vadd.f32 %v1522_v32, %v977_v24  ;;  %v1525_v42 = vmax.f32 %v1523_v31, 0.0 }
 0x86b   : > { %v1526_v43 = vmax.f32 %v1524_v39, 0.0 }
 0x86d   : > { %v1527_v44 = vpack.c.bf16 %v1526_v43, %v1525_v42 }
 0x86f   : > { %1869 = vmatmul.mubr.msk.bf16.vlgmr.msra.gmra.mrb[20].mxu0 %vm459_vm1, %v1527_v44 }
 0x942   : > { %v1588_v13 = vpop.f32.mrb[20].mxu0 }
 0x943   : > { %v1589_v23 = vadd.f32 %v1751_v45, %v1588_v13  ;;  %v1870_v46 = vpop.f32.mrb[21].mxu0 }
 0x944   : > { %v1591_v15 = vpop.f32.mrb[22].mxu0 }
 0x945   : > { %1595 = vst [vmem:[%s407_s17] sm:$0xff] %v1589_v23  ;;  %v1592_v24 = vadd.f32 %v1751_v45, %v1591_v15  ;;  %v1871_v47 = vpop.f32.mrb[23].mxu0 }
 0x947   : > { %1596 = vst [vmem:[%s407_s17 + $0x8] sm:$0xff] %v1592_v24 }
 0x948   : > { %2033 = shalt.err (!%p2030_p3)
}
 0x949   : > { %s2034_s29 = scalar_lea.hbm %s2567_s26, 256  ;;  %s2038_s16 = scalar_lea.hbm %s2621_s11, 512 }
 0x94a   : > { %p2035_p4 = scmp.ne.s32.totalorder %s2567_s26, %s2034_s29  ;;  %p2039_p9 = scmp.lt.u32.totalorder %s2567_s26, %s2621_s11 }
 0x94b   : > { %p2040_p10 = scmp.lt.u32.totalorder %s2038_s16, %s2034_s29  ;;  %p2042_p12 = scmp.lt.u32.totalorder %s2034_s29, %s2567_s26 }
 0x94c   : > { %p2036_p7 = pnand %p2035_p4, %p2201_p5 }
 0x94d   : > { %p2041_p11 = por %p2040_p10, %p2039_p9 }
 0x94e   : > { %p2037_p8 = pneg %p2036_p7 }
 0x94f   : > { %p2043_p13 = por %p2042_p12, %p2041_p11 }
 0x951   : > { %p2044_p0 = pnand %p2043_p13, %p2037_p8 }
 0x953   : > { %2047 = shalt.err (!%p2044_p0)
}
 0x954   : > { %s2096_s1 = smov 128   ;;  %s2097_s25 = smov 8  }
 0x955   : > { %1872 = dma.vmem_to_hbm [thread:$0]  (%p2201_p5), %s2562_s19, 256, %s2567_s26, %s2569_s20, %s2096_s1, %s2096_s1, %s2097_s25  }
 0x956 PF: > { %p1878_p1 = scmp.ge.s32.totalorder %s2082_s24, 2  ;;  %s1634_s28 = sand.u32 1, %s2070_s21  }
 0x957   : > { %s1635_s29 = scalar_lea.sflag [#allocation3], %s1634_s28 }
 0x958   : > { %p1875_p2 = pnand %p1878_p1, %p2205_p6 }
 0x95a   : > { %2065 = dma.done.wait (!%p1875_p2), %s1635_s29, 256  }
 0x95b   : > { %2067 = vsyncadd (!%p1875_p2), %s1635_s29, 4294967040  ;;  %p23_p3 = scmp.ge.s32.totalorder %s2188_s27, 4   ;;  %s2638_s21 = smov %s2074_s22 }
 0x95c   : > { %s2639_s22 = smov %s2078_s23  ;;  %s2640_s23 = smov %s2199_s30 }
 0x95d   : > { %s2641_s24 = smov %s2188_s27  ;;  %25 = sbr.rel (!%p23_p3) target bundleno = 6 (0x6), region = 113 }
 0x964   :  { %1648 = vsyncpa [#allocation3], 1 }
 0x965   :  { %1650 = vsyncpa [#allocation3 + $0x1], 1 }

</bundles_post_ra>
